<compile_context>
chip_gen: v7x
topology: tpu7x:2x2x1
jax: 0.10.0
libtpu: 0.0.40
codegen_flags: <defaults>
</compile_context>

<pallas_src>
import functools
import math

import jax
import jax.numpy as jnp
from jax.experimental import pallas as pl
from jax.experimental.pallas import tpu as pltpu


def _dice_kernel(x_ref, alpha_ref, o_ref, *, eps):
    # x_ref: (N, tile_d), alpha_ref: (1, tile_d), o_ref: (N, tile_d)
    x = x_ref[...].astype(jnp.float32)          # do the math in f32 even for bf16 inputs
    alpha = alpha_ref[...].astype(jnp.float32)  # broadcasts over rows

    n = x.shape[0]
    inv_n = 1.0 / float(n)
    mean = jnp.sum(x, axis=0, keepdims=True) * inv_n
    xc = x - mean
    var = jnp.sum(xc * xc, axis=0, keepdims=True) * inv_n   # biased var (BatchNorm training)
    x_hat = xc * jax.lax.rsqrt(var + eps)                    # EUP rsqrt, off the VPU path
    p = jax.nn.sigmoid(x_hat)
    out = p * x + alpha * (1.0 - p) * x
    o_ref[...] = out.astype(o_ref.dtype)


def dice(x, alpha, *, eps=1e-9, target_block_bytes=2 << 20):
    """Dice forward. x: (N, D), alpha: (D,). Returns (N, D) in x.dtype."""
    assert x.ndim == 2, "Dice expects a 2D (batch, input_dim) input (BatchNorm1d layout)"
    N, D = x.shape
    lanes = 128
    itemsize = jnp.dtype(x.dtype).itemsize

    # Feature dim padded up to lane multiple (only if needed).
    d_pad = pl.cdiv(D, lanes) * lanes

    # Pick the widest lane-multiple feature tile that (a) keeps the (N, tile_d) block
    # around ~target_block_bytes and (b) divides d_pad exactly (no ragged grid tail).
    max_tile = max(lanes, (target_block_bytes // max(1, N * itemsize)) // lanes * lanes)
    max_tile = min(max_tile, d_pad)
    tile_d = lanes
    t = max_tile
    while t >= lanes:
        if d_pad % t == 0:
            tile_d = t
            break
        t -= lanes

    if d_pad != D:
        x_in = jnp.pad(x, ((0, 0), (0, d_pad - D)))
        a_in = jnp.pad(alpha, (0, d_pad - D))
    else:
        x_in, a_in = x, alpha
    a_in = jnp.reshape(a_in, (1, d_pad)).astype(x.dtype)

    grid = (d_pad // tile_d,)
    block_bytes = N * tile_d * itemsize
    # Leave room for double-buffered in/out blocks; stay within physical VMEM on v7x.
    vmem_limit = int(min(64 << 20, max(32 << 20, 6 * block_bytes)))
    # TODO(synk): for very large batch N (block (N,128) > ~8 MiB), a two-pass reduction
    # over a batch grid axis would be needed instead of holding the full batch per block.

    out = pl.pallas_call(
        functools.partial(_dice_kernel, eps=eps),
        out_shape=jax.ShapeDtypeStruct((N, d_pad), x.dtype),
        grid_spec=pltpu.PrefetchScalarGridSpec(
            num_scalar_prefetch=0,
            grid=grid,
            in_specs=[
                pl.BlockSpec((N, tile_d), lambda j: (0, j)),   # full batch, feature tile
                pl.BlockSpec((1, tile_d), lambda j: (0, j)),   # alpha tile
            ],
            out_specs=pl.BlockSpec((N, tile_d), lambda j: (0, j)),
        ),
        compiler_params=pltpu.CompilerParams(
            dimension_semantics=("parallel",),
            vmem_limit_bytes=vmem_limit,
        ),
    )(x_in, a_in)

    if d_pad != D:
        out = out[:, :D]
    return out


def dice_ref(x, alpha, eps=1e-9):
    # Pure-JAX reference matching the PyTorch module's training-mode forward.
    xf = x.astype(jnp.float32)
    mean = jnp.mean(xf, axis=0, keepdims=True)
    var = jnp.mean((xf - mean) ** 2, axis=0, keepdims=True)   # biased, as BatchNorm uses
    x_hat = (xf - mean) * jax.lax.rsqrt(var + eps)
    p = jax.nn.sigmoid(x_hat)
    out = p * xf + alpha.astype(jnp.float32)[None, :] * (1.0 - p) * xf
    return out.astype(x.dtype)


if __name__ == "__main__":
    key = jax.random.PRNGKey(0)
    kx, ka = jax.random.split(key)
    # Small (batch, input_dim) input consistent with Dice / BatchNorm1d usage.
    N, D = 8, 32
    x = jax.random.normal(kx, (N, D), dtype=jnp.float32)
    alpha = 0.25 * jax.random.normal(ka, (D,), dtype=jnp.float32)  # nonzero to exercise gate

    out = dice(x, alpha)
    out = jax.block_until_ready(out)

    ref = dice_ref(x, alpha)
    assert out.shape == x.shape and out.dtype == x.dtype
    assert jnp.allclose(out, ref, atol=1e-5, rtol=1e-5)

    print("KERNEL_OK")
</pallas_src>

<mosaic_0001>
module attributes {stable_mosaic.version = 11 : i64} {
  func.func @_dice_kernel(%arg0: i32, %arg1: memref<8x128xf32, #tpu.memory_space<vmem>>, %arg2: memref<1x128xf32, #tpu.memory_space<vmem>>, %arg3: memref<8x128xf32, #tpu.memory_space<vmem>>) attributes {dimension_semantics = [#tpu.dimension_semantics<parallel>], iteration_bounds = array<i64: 1>, scalar_prefetch = 0 : i64, scratch_operands = 0 : i64, tpu.core_type = #tpu.core_type<tc>, window_params = [{transform_indices = @transform_0, window_bounds = array<i64: 8, 128>}, {transform_indices = @transform_1, window_bounds = array<i64: 1, 128>}, {transform_indices = @transform_2, window_bounds = array<i64: 8, 128>}]} {
    %c0 = arith.constant 0 : index
    %c0_0 = arith.constant 0 : index
    %0 = vector.load %arg1[%c0, %c0_0] : memref<8x128xf32, #tpu.memory_space<vmem>>, vector<8x128xf32>
    %c0_1 = arith.constant 0 : index
    %c0_2 = arith.constant 0 : index
    %1 = vector.load %arg2[%c0_1, %c0_2] : memref<1x128xf32, #tpu.memory_space<vmem>>, vector<1x128xf32>
    %cst = arith.constant dense<0.000000e+00> : vector<128xf32>
    %2 = vector.multi_reduction <add>, %0, %cst [0] : vector<8x128xf32> to vector<128xf32>
    %3 = vector.shape_cast %2 : vector<128xf32> to vector<1x128xf32>
    %cst_3 = arith.constant 1.250000e-01 : f32
    %4 = vector.broadcast %cst_3 : f32 to vector<1x128xf32>
    %5 = arith.mulf %3, %4 : vector<1x128xf32>
    %6 = vector.broadcast %5 : vector<1x128xf32> to vector<8x128xf32>
    %7 = arith.subf %0, %6 : vector<8x128xf32>
    %8 = arith.mulf %7, %7 : vector<8x128xf32>
    %cst_4 = arith.constant dense<0.000000e+00> : vector<128xf32>
    %9 = vector.multi_reduction <add>, %8, %cst_4 [0] : vector<8x128xf32> to vector<128xf32>
    %10 = vector.shape_cast %9 : vector<128xf32> to vector<1x128xf32>
    %cst_5 = arith.constant 1.250000e-01 : f32
    %11 = vector.broadcast %cst_5 : f32 to vector<1x128xf32>
    %12 = arith.mulf %10, %11 : vector<1x128xf32>
    %cst_6 = arith.constant 9.99999971E-10 : f32
    %13 = vector.broadcast %cst_6 : f32 to vector<1x128xf32>
    %14 = arith.addf %12, %13 : vector<1x128xf32>
    %15 = math.rsqrt %14 : vector<1x128xf32>
    %16 = vector.broadcast %15 : vector<1x128xf32> to vector<8x128xf32>
    %17 = arith.mulf %7, %16 : vector<8x128xf32>
    %18 = arith.negf %17 : vector<8x128xf32>
    %19 = math.exp %18 : vector<8x128xf32>
    %cst_7 = arith.constant 1.000000e+00 : f32
    %20 = vector.broadcast %cst_7 : f32 to vector<8x128xf32>
    %21 = arith.addf %20, %19 : vector<8x128xf32>
    %22 = arith.divf %20, %21 : vector<8x128xf32>
    %23 = arith.mulf %22, %0 : vector<8x128xf32>
    %cst_8 = arith.constant 1.000000e+00 : f32
    %24 = vector.broadcast %cst_8 : f32 to vector<8x128xf32>
    %25 = arith.subf %24, %22 : vector<8x128xf32>
    %26 = vector.broadcast %1 : vector<1x128xf32> to vector<8x128xf32>
    %27 = arith.mulf %26, %25 : vector<8x128xf32>
    %28 = arith.mulf %27, %0 : vector<8x128xf32>
    %29 = arith.addf %23, %28 : vector<8x128xf32>
    %c0_9 = arith.constant 0 : index
    %c0_10 = arith.constant 0 : index
    %30 = vector.load %arg3[%c0_9, %c0_10] : memref<8x128xf32, #tpu.memory_space<vmem>>, vector<8x128xf32>
    tpu.vector_store %arg3[%c0_9, %c0_10], %29 {strides = array<i32>} : memref<8x128xf32, #tpu.memory_space<vmem>>, vector<8x128xf32>,
    return
  }
  func.func @transform_0(%arg0: i32) -> (i32, i32) {
    %c0_i32 = arith.constant 0 : i32
    %c0_i32_0 = arith.constant 0 : i32
    return %c0_i32, %arg0 : i32, i32
  }
  func.func @transform_1(%arg0: i32) -> (i32, i32) {
    %c0_i32 = arith.constant 0 : i32
    %c0_i32_0 = arith.constant 0 : i32
    return %c0_i32, %arg0 : i32, i32
  }
  func.func @transform_2(%arg0: i32) -> (i32, i32) {
    %c0_i32 = arith.constant 0 : i32
    %c0_i32_0 = arith.constant 0 : i32
    return %c0_i32, %arg0 : i32, i32
  }
}

</mosaic_0001>

<bundles_post_ra>
// kernel: tpu_custom_call.1
= control target key start
LH: loop header
LB: loop body
LE: loop exit
PB: predicated region body
PF: predicated region fallthrough
CT: control target
= control target key end

     0   :  { %7 = vsyncpa [#allocation3], 0  ;;  %s180_s0 = inlined_call_operand.hbm [shape: f32[8,128], index: 0, kind: input, shape index: {}]   ;;  %s181_s1 = inlined_call_operand.vmem [shape: f32[1,128], index: 1, kind: input, shape index: {}]   ;;  %s182_s2 = inlined_call_operand.hbm [shape: f32[8,128], index: 2, kind: output, shape index: {}]  }
   0x1   :  { %8 = vsyncpa [#allocation4], 0  ;;  %s136_s9 = smov [#allocation2]   ;;  %s88_s13 = scalar_lea.hbm %s180_s0, 128 }
   0x2   :  { %s15_s10 = sshll.u32 %s136_s9, 4  ;;  %p89_p0 = scmp.ne.s32.totalorder %s180_s0, %s88_s13  ;;  %s16_s10 = int_to_ptr.vmem [resolvable:$true] %s15_s10 }
   0x3   :  { %p92_p1 = scmp.lt.u32.totalorder %s88_s13, %s180_s0 }
   0x5   :  { %p94_p2 = pnand %p92_p1, %p89_p0 }
   0x7   :  { %97 = shalt.err (!%p94_p2)
}
   0x8   :  { %s98_s18 = scalar_lea.vmem %s16_s10, 128  ;;  %p103_p4 = scmp.lt.s32.totalorder %s16_s10, %s16_s10 }
   0x9   :  { %p99_p3 = scmp.ne.s32.totalorder %s16_s10, %s98_s18  ;;  %p104_p5 = scmp.lt.s32.totalorder %s98_s18, %s98_s18 }
   0xb   :  { %p105_p6 = por %p104_p5, %p103_p4 }
   0xd   :  { %p106_p7 = pnand %p105_p6, %p99_p3 }
   0xf   :  { %109 = shalt.err (!%p106_p7)
}
  0x10   :  { %18 = dma.hbm_to_vmem [thread:$0]  %s180_s0, 128, %s16_s10, [#allocation3]  }
  0x11   :  { %132 = dma.done.wait [#allocation3], 128  }
  0x12   :  { %133 = vsyncadd [#allocation3], 4294967168  ;;  %v24_v0 = vld [vmem:[#allocation2] sm:$0xff]  ;;  %s137_s22 = smov [#allocation5]  }
  0x13   :  { %v26_v1 = vrot.slane %v24_v0, 4  ;;  %v79_v24 = vld [vmem:[%s181_s1] ss:$0 sm:$0xff]  ;;  %s69_s23 = sshll.u32 %s137_s22, 4  ;;  %s70_s23 = int_to_ptr.vmem [resolvable:$true] %s69_s23 }
  0x14   :  { %s110_s24 = scalar_lea.vmem %s70_s23, 128  ;;  %p115_p9 = scmp.lt.s32.totalorder %s70_s23, %s70_s23 }
  0x15   :  { %v27_v2 = vadd.f32 %v26_v1, %v24_v0  ;;  %p111_p8 = scmp.ne.s32.totalorder %s70_s23, %s110_s24  ;;  %p116_p10 = scmp.lt.s32.totalorder %s110_s24, %s110_s24 }
  0x17   :  { %v28_v3 = vrot.slane %v27_v2, 2  ;;  %p117_p11 = por %p116_p10, %p115_p9 }
  0x19   :  { %v29_v4 = vadd.f32 %v28_v3, %v27_v2  ;;  %p118_p12 = pnand %p117_p11, %p111_p8 }
  0x1b   :  { %v30_v5 = vrot.slane %v29_v4, 1 }
  0x1d   :  { %v31_v6 = vadd.f32 %v30_v5, %v29_v4 }
  0x1f   :  { %v32_v7 = vmul.f32 0.125, %v31_v6 }
  0x21   :  { %v33_v8 = vsub.f32 %v24_v0, %v32_v7 }
  0x23   :  { %v34_v9 = vmul.f32 %v33_v8, %v33_v8 }
  0x25   :  { %v35_v10 = vrot.slane %v34_v9, 4 }
  0x27   :  { %v36_v11 = vadd.f32 %v35_v10, %v34_v9 }
  0x29   :  { %v37_v12 = vrot.slane %v36_v11, 2 }
  0x2b   :  { %v38_v13 = vadd.f32 %v37_v12, %v36_v11 }
  0x2d   :  { %v39_v14 = vrot.slane %v38_v13, 1 }
  0x2f   :  { %v40_v15 = vadd.f32 %v39_v14, %v38_v13 }
  0x31   :  { %v41_v16 = vmul.f32 0.125, %v40_v15 }
  0x33   :  { %v42_v17 = vadd.f32 1e-09, %v41_v16 }
  0x35   :  { %82 = vrsqrt.f32 %v42_v17 }
  0x3f   :  { %v83_v18 = vpop.eup %82 }
  0x40   :  { %v44_v19 = vmul.f32 %v83_v18, %v33_v8 }
  0x42   :  { %v78_v20 = vmul.f32 -1.442695, %v44_v19 }
  0x44   :  { %84 = vpow2.f32 %v78_v20 }
  0x4e   :  { %v85_v21 = vpop.eup %84 }
  0x4f   :  { %v48_v22 = vadd.f32 1.0, %v85_v21 }
  0x51   :  { %86 = vrcp.f32 %v48_v22 }
  0x5b   :  { %v87_v23 = vpop.eup %86 }
  0x5c   :  { %v52_v25 = vsub.f32 1.0, %v87_v23  ;;  %v51_v26 = vmul.f32 %v87_v23, %v24_v0 }
  0x5e   :  { %v59_v27 = vmul.f32 %v79_v24, %v52_v25 }
  0x60   :  { %v60_v28 = vmul.f32 %v59_v27, %v24_v0 }
  0x62   :  { %v61_v29 = vadd.f32 %v60_v28, %v51_v26 }
  0x64   :  { %62 = vst [vmem:[#allocation5] sm:$0xff] %v61_v29 }
  0x65   :  { %121 = shalt.err (!%p118_p12)
}
  0x66   :  { %s122_s1 = scalar_lea.hbm %s182_s2, 128 }
  0x67   :  { %p123_p13 = scmp.ne.s32.totalorder %s182_s2, %s122_s1  ;;  %p126_p0 = scmp.lt.u32.totalorder %s122_s1, %s182_s2 }
  0x69   :  { %p128_p1 = pnand %p126_p0, %p123_p13 }
  0x6b   :  { %131 = shalt.err (!%p128_p1)
}
  0x6c   :  { %72 = dma.vmem_to_hbm [thread:$0]  %s70_s23, 128, %s182_s2, [#allocation4]  }
  0x6d   :  { %134 = dma.done.wait [#allocation4], 128  }
  0x6e   :  { %135 = vsyncadd [#allocation4], 4294967168 }
  0x6f   :  { %76 = vsyncpa [#allocation3], 1 }
  0x70   :  { %77 = vsyncpa [#allocation4], 1 }

</bundles_post_ra>
